<compile_context>
chip_gen: v6e
topology: v6e:2x2x1
jax: 0.10.0
libtpu: 0.0.40
codegen_flags: <defaults>
</compile_context>

<pallas_src>
import functools

import jax
import jax.numpy as jnp
from jax import lax
from jax.experimental import pallas as pl
from jax.experimental.pallas import tpu as pltpu


def _round_up(x, m):
    return ((x + m - 1) // m) * m


def _vmem_limit_bytes():
    """Generation-aware scoped-VMEM budget (~75% of per-core VMEM, capped at 100 MiB)."""
    default = 48 * 1024 * 1024  # safe on every generation (v7x physical = 64 MiB/TC)
    try:
        info = pltpu.get_tpu_info()
        cap = getattr(info, "vmem_capacity_bytes", None)
        if not cap:
            return default
        return int(min(cap * 3 // 4, 100 * 1024 * 1024))
    except Exception:
        return default


def _patch_embed_kernel(p_ref, w_ref, c_ref, o_ref, *, eps, d_true):
    # p_ref: (tm, K)  patch rows (compute dtype, possibly bf16)
    # w_ref: (K, Dp)  projection weight (compute dtype), resident across the grid
    # c_ref: (8, Dp)  f32 consts: row 0 = conv bias, row 1 = LN gamma, row 2 = LN beta,
    #                 zero-padded beyond the true D columns (and in rows 3..7).
    # o_ref: (tm, Dp)
    y = jnp.dot(p_ref[...], w_ref[...],
                preferred_element_type=jnp.float32)          # MXU, f32 accumulation
    y = y + c_ref[0:1, :]                                     # conv bias; padded cols stay 0

    # LayerNorm over the true D columns (biased variance, like torch.nn.LayerNorm).
    # Padded columns contribute 0 to both sums, so sums over Dp with a 1/D divisor give
    # the exact statistics over D in a single fused pass.
    inv_d = jnp.float32(1.0 / d_true)
    s1 = jnp.sum(y, axis=-1, keepdims=True)
    s2 = jnp.sum(y * y, axis=-1, keepdims=True)
    mean = s1 * inv_d
    var = jnp.maximum(s2 * inv_d - mean * mean, 0.0)
    y = (y - mean) * lax.rsqrt(var + eps)
    # gamma / beta are zero in padded columns -> padded output columns are exactly 0.
    o_ref[...] = (y * c_ref[1:2, :] + c_ref[2:3, :]).astype(o_ref.dtype)


def patch_embed(img, conv_w, conv_b, ln_gamma, ln_beta, *, patch_size, eps=1e-5,
                block_rows=512, compute_dtype=jnp.bfloat16, out_dtype=None):
    """img: (B, C, H, W); conv_w: (D, C, P, P); conv_b/ln_gamma/ln_beta: (D,).

    Returns (B, N, D) in `out_dtype` (defaults to img.dtype, matching the module;
    pass out_dtype=jnp.bfloat16 to halve output HBM traffic when downstream allows).
    """
    B, C, H, W = img.shape
    D = conv_w.shape[0]
    P = patch_size
    Gh, Gw = H // P, W // P
    N = Gh * Gw
    K = C * P * P
    M = B * N
    out_dtype = img.dtype if out_dtype is None else out_dtype

    # Lane-dense output only when padding is actually needed (ViT widths 768/1024 need none).
    # (On v6e/v7x one could round small D up to 256 to fill the 256-wide MXU; irrelevant
    #  for real ViT widths, so not special-cased here.)
    Dp = D if D % 128 == 0 else _round_up(D, 128)

    # Row tile: large (default 512, multiple of 256) to amortize per-step overhead and give
    # long lane-dense DMA bursts; ragged tail handled by a cdiv grid (masked last block).
    tm = min(_round_up(block_rows, 8), _round_up(M, 8))
    grid_m = pl.cdiv(M, tm)

    # Patchify NCHW -> (M, K) rows in (c, ph, pw) column order, cast to compute dtype
    # BEFORE the transpose so this extra pass moves bf16, not f32.  No K / M padding.
    # TODO(synk): fold this rearrangement into the kernel's input DMA to remove the pass.
    patches = img.astype(compute_dtype).reshape(B, C, Gh, P, Gw, P)
    patches = patches.transpose(0, 2, 4, 1, 3, 5).reshape(M, K)

    w_mat = conv_w.reshape(D, K).T.astype(compute_dtype)      # (K, D), tiny
    if Dp != D:
        w_mat = jnp.pad(w_mat, ((0, 0), (0, Dp - D)))

    consts = jnp.stack([conv_b, ln_gamma, ln_beta]).astype(jnp.float32)   # (3, D)
    consts = jnp.pad(consts, ((0, 5), (0, Dp - D)))                        # (8, Dp)

    kernel = functools.partial(_patch_embed_kernel, eps=eps, d_true=D)

    out = pl.pallas_call(
        kernel,
        out_shape=jax.ShapeDtypeStruct((M, Dp), out_dtype),
        grid_spec=pltpu.PrefetchScalarGridSpec(
            num_scalar_prefetch=0,
            grid=(grid_m,),
            in_specs=[
                pl.BlockSpec((tm, K), lambda i: (i, 0)),    # patch rows (tiled over M)
                pl.BlockSpec((K, Dp), lambda i: (0, 0)),    # projection weight (resident)
                pl.BlockSpec((8, Dp), lambda i: (0, 0)),    # bias/gamma/beta (resident)
            ],
            out_specs=pl.BlockSpec((tm, Dp), lambda i: (i, 0)),
        ),
        compiler_params=pltpu.CompilerParams(
            dimension_semantics=("parallel",),
            vmem_limit_bytes=_vmem_limit_bytes(),
        ),
    )(patches, w_mat, consts)

    if Dp != D:
        out = out[:, :D]          # only for non-128-multiple D (never for ViT 768/1024)
    return out.reshape(B, N, D)


def _reference(img, conv_w, conv_b, ln_gamma, ln_beta, *, patch_size, eps=1e-5):
    # Pure-JAX reference mirroring the PyTorch forward.
    y = lax.conv_general_dilated(
        img, conv_w, window_strides=(patch_size, patch_size), padding="VALID",
        dimension_numbers=("NCHW", "OIHW", "NCHW"))
    y = y + conv_b[None, :, None, None]
    B, D = y.shape[0], y.shape[1]
    y = y.reshape(B, D, -1).transpose(0, 2, 1)               # (B, N, D)
    mean = jnp.mean(y, axis=-1, keepdims=True)
    var = jnp.mean((y - mean) ** 2, axis=-1, keepdims=True)
    y = (y - mean) / jnp.sqrt(var + eps)
    return y * ln_gamma + ln_beta


if __name__ == "__main__":
    # Small shapes consistent with the module: image 16x16, patch 4, C=4, D=32, batch 2.
    image_size, patch_size, in_ch, out_dims = 16, 4, 4, 32
    batch = 2

    key = jax.random.PRNGKey(0)
    k_img, k_w, k_b = jax.random.split(key, 3)

    img = jax.random.normal(k_img, (batch, in_ch, image_size, image_size),
                            dtype=jnp.float32)
    conv_w = 0.05 * jax.random.normal(
        k_w, (out_dims, in_ch, patch_size, patch_size), dtype=jnp.float32)
    conv_b = 0.01 * jax.random.normal(k_b, (out_dims,), dtype=jnp.float32)
    # LayerNorm default init (ones / zeros), deterministic.
    ln_gamma = jnp.ones((out_dims,), dtype=jnp.float32)
    ln_beta = jnp.zeros((out_dims,), dtype=jnp.float32)

    ref = _reference(img, conv_w, conv_b, ln_gamma, ln_beta, patch_size=patch_size)
    n_patches = (image_size // patch_size) ** 2

    # f32 operands: tight correctness check against the conv reference.
    out_f32 = patch_embed(img, conv_w, conv_b, ln_gamma, ln_beta,
                          patch_size=patch_size, compute_dtype=jnp.float32)
    out_f32 = jax.block_until_ready(out_f32)
    assert out_f32.shape == (batch, n_patches, out_dims)
    assert jnp.allclose(out_f32, ref, atol=2e-4, rtol=2e-4)

    # bf16 MXU operands (default fast path): looser tolerance vs the f32 reference.
    out_bf16 = patch_embed(img, conv_w, conv_b, ln_gamma, ln_beta,
                           patch_size=patch_size)
    out_bf16 = jax.block_until_ready(out_bf16)
    assert out_bf16.shape == (batch, n_patches, out_dims)
    assert jnp.allclose(out_bf16, ref, atol=5e-2, rtol=5e-2)

    # bf16 output path (reduced output HBM traffic for downstream bf16 consumers).
    out_bf16o = patch_embed(img, conv_w, conv_b, ln_gamma, ln_beta,
                            patch_size=patch_size, out_dtype=jnp.bfloat16)
    out_bf16o = jax.block_until_ready(out_bf16o)
    assert out_bf16o.dtype == jnp.bfloat16
    assert jnp.allclose(out_bf16o.astype(jnp.float32), ref, atol=8e-2, rtol=8e-2)

    print("KERNEL_OK")
</pallas_src>

<mosaic_0001>
module attributes {stable_mosaic.version = 11 : i64} {
  func.func @_patch_embed_kernel(%arg0: i32, %arg1: memref<32x64xf32, #tpu.memory_space<vmem>>, %arg2: memref<64x128xf32, #tpu.memory_space<vmem>>, %arg3: memref<8x128xf32, #tpu.memory_space<vmem>>, %arg4: memref<32x128xf32, #tpu.memory_space<vmem>>) attributes {dimension_semantics = [#tpu.dimension_semantics<parallel>], iteration_bounds = array<i64: 1>, scalar_prefetch = 0 : i64, scratch_operands = 0 : i64, tpu.core_type = #tpu.core_type<tc>, window_params = [{transform_indices = @transform_0, window_bounds = array<i64: 32, 64>}, {pipeline_mode = #tpu.pipeline_mode<synchronous>, transform_indices = @transform_1, window_bounds = array<i64: 64, 128>}, {pipeline_mode = #tpu.pipeline_mode<synchronous>, transform_indices = @transform_2, window_bounds = array<i64: 8, 128>}, {transform_indices = @transform_3, window_bounds = array<i64: 32, 128>}]} {
    %c0 = arith.constant 0 : index
    %c0_0 = arith.constant 0 : index
    %0 = vector.load %arg1[%c0, %c0_0] : memref<32x64xf32, #tpu.memory_space<vmem>>, vector<32x64xf32>
    %c0_1 = arith.constant 0 : index
    %c0_2 = arith.constant 0 : index
    %1 = vector.load %arg2[%c0_1, %c0_2] : memref<64x128xf32, #tpu.memory_space<vmem>>, vector<64x128xf32>
    %cst = arith.constant dense<0.000000e+00> : vector<32x128xf32>
    %2 = tpu.matmul %0, %1, %cst {dimension_numbers = #tpu.dot_dimension_numbers<[1], [0], [0], [1], [0, 0, 1, 1], [], []>} : vector<32x64xf32>, vector<64x128xf32>, vector<32x128xf32> -> vector<32x128xf32>
    %c0_3 = arith.constant 0 : index
    %c0_4 = arith.constant 0 : index
    %3 = vector.load %arg3[%c0_3, %c0_4] : memref<8x128xf32, #tpu.memory_space<vmem>>, vector<1x128xf32>
    %4 = vector.broadcast %3 : vector<1x128xf32> to vector<32x128xf32>
    %5 = arith.addf %2, %4 : vector<32x128xf32>
    %cst_5 = arith.constant dense<0.000000e+00> : vector<32xf32>
    %6 = vector.multi_reduction <add>, %5, %cst_5 [1] : vector<32x128xf32> to vector<32xf32>
    %7 = vector.shape_cast %6 : vector<32xf32> to vector<32x1xf32>
    %8 = arith.mulf %5, %5 : vector<32x128xf32>
    %cst_6 = arith.constant dense<0.000000e+00> : vector<32xf32>
    %9 = vector.multi_reduction <add>, %8, %cst_6 [1] : vector<32x128xf32> to vector<32xf32>
    %10 = vector.shape_cast %9 : vector<32xf32> to vector<32x1xf32>
    %cst_7 = arith.constant 3.125000e-02 : f32
    %11 = vector.broadcast %cst_7 : f32 to vector<32x1xf32>
    %12 = arith.mulf %7, %11 : vector<32x1xf32>
    %cst_8 = arith.constant 3.125000e-02 : f32
    %13 = vector.broadcast %cst_8 : f32 to vector<32x1xf32>
    %14 = arith.mulf %10, %13 : vector<32x1xf32>
    %15 = arith.mulf %12, %12 : vector<32x1xf32>
    %16 = arith.subf %14, %15 : vector<32x1xf32>
    %cst_9 = arith.constant 0.000000e+00 : f32
    %17 = vector.broadcast %cst_9 : f32 to vector<32x1xf32>
    %18 = arith.maximumf %16, %17 : vector<32x1xf32>
    %19 = vector.broadcast %12 : vector<32x1xf32> to vector<32x128xf32>
    %20 = arith.subf %5, %19 : vector<32x128xf32>
    %cst_10 = arith.constant 9.99999974E-6 : f32
    %21 = vector.broadcast %cst_10 : f32 to vector<32x1xf32>
    %22 = arith.addf %18, %21 : vector<32x1xf32>
    %23 = math.rsqrt %22 : vector<32x1xf32>
    %24 = vector.broadcast %23 : vector<32x1xf32> to vector<32x128xf32>
    %25 = arith.mulf %20, %24 : vector<32x128xf32>
    %c1 = arith.constant 1 : index
    %c0_11 = arith.constant 0 : index
    %26 = vector.load %arg3[%c1, %c0_11] : memref<8x128xf32, #tpu.memory_space<vmem>>, vector<1x128xf32>
    %27 = vector.broadcast %26 : vector<1x128xf32> to vector<32x128xf32>
    %28 = arith.mulf %25, %27 : vector<32x128xf32>
    %c2 = arith.constant 2 : index
    %c0_12 = arith.constant 0 : index
    %29 = vector.load %arg3[%c2, %c0_12] : memref<8x128xf32, #tpu.memory_space<vmem>>, vector<1x128xf32>
    %30 = vector.broadcast %29 : vector<1x128xf32> to vector<32x128xf32>
    %31 = arith.addf %28, %30 : vector<32x128xf32>
    %c0_13 = arith.constant 0 : index
    %c0_14 = arith.constant 0 : index
    %32 = vector.load %arg4[%c0_13, %c0_14] : memref<32x128xf32, #tpu.memory_space<vmem>>, vector<32x128xf32>
    tpu.vector_store %arg4[%c0_13, %c0_14], %31 {strides = array<i32>} : memref<32x128xf32, #tpu.memory_space<vmem>>, vector<32x128xf32>,
    return
  }
  func.func @transform_0(%arg0: i32) -> (i32, i32) {
    %c0_i32 = arith.constant 0 : i32
    %c0_i32_0 = arith.constant 0 : i32
    return %arg0, %c0_i32 : i32, i32
  }
  func.func @transform_1(%arg0: i32) -> (i32, i32) {
    %c0_i32 = arith.constant 0 : i32
    %c0_i32_0 = arith.constant 0 : i32
    %c0_i32_1 = arith.constant 0 : i32
    return %c0_i32, %c0_i32_0 : i32, i32
  }
  func.func @transform_2(%arg0: i32) -> (i32, i32) {
    %c0_i32 = arith.constant 0 : i32
    %c0_i32_0 = arith.constant 0 : i32
    %c0_i32_1 = arith.constant 0 : i32
    return %c0_i32, %c0_i32_0 : i32, i32
  }
  func.func @transform_3(%arg0: i32) -> (i32, i32) {
    %c0_i32 = arith.constant 0 : i32
    %c0_i32_0 = arith.constant 0 : i32
    return %arg0, %c0_i32 : i32, i32
  }
}

</mosaic_0001>

<bundles_post_ra>
// kernel: tpu_custom_call.1
= control target key start
LH: loop header
LB: loop body
LE: loop exit
PB: predicated region body
PF: predicated region fallthrough
CT: control target
= control target key end

     0   :  { %8 = vsyncpa [#allocation3], 0  ;;  %s481_s0 = inlined_call_operand.hbm [shape: f32[32,64], index: 0, kind: input, shape index: {}]   ;;  %s482_s1 = inlined_call_operand.hbm [shape: f32[64,128], index: 1, kind: input, shape index: {}]   ;;  %s483_s2 = inlined_call_operand.hbm [shape: f32[8,128], index: 2, kind: input, shape index: {}]   ;;  %s484_s3 = inlined_call_operand.hbm [shape: f32[32,128], index: 3, kind: output, shape index: {}]  }
   0x1   :  { %9 = vsyncpa [#allocation6], 0 }
   0x2   :  { %10 = vsyncpa [#allocation4], 0  ;;  %s422_s12 = smov [#allocation5]   ;;  %s423_s14 = smov [#allocation2]  }
   0x3   :  { %s28_s13 = sshll.u32 %s422_s12, 4  ;;  %s16_s15 = sshll.u32 %s423_s14, 4  ;;  %s29_s13 = int_to_ptr.vmem [resolvable:$true] %s28_s13  ;;  %s17_s15 = int_to_ptr.vmem [resolvable:$true] %s16_s15 }
   0x4   :  { %s344_s16 = scalar_lea.vmem %s29_s13, 1024  ;;  %p349_p1 = scmp.lt.s32.totalorder %s29_s13, %s29_s13 }
   0x5   :  { %p345_p0 = scmp.ne.s32.totalorder %s29_s13, %s344_s16  ;;  %p350_p2 = scmp.lt.s32.totalorder %s344_s16, %s344_s16 }
   0x7   :  { %p351_p3 = por %p350_p2, %p349_p1 }
   0x9   :  { %p352_p4 = pnand %p351_p3, %p345_p0 }
   0xb   :  { %355 = shalt.err (!%p352_p4)
}
   0xc   :  { %s424_s17 = smov 128   ;;  %s425_s18 = smov 8  }
   0xd   :  { %34 = dma.hbm_to_vmem [thread:$0]  %s482_s1, 1024, %s29_s13, [#allocation6], %s424_s17, %s424_s17, %s425_s18  }
   0xe   :  { %s364_s21 = scalar_lea.vmem %s17_s15, 512  ;;  %p369_p6 = scmp.lt.s32.totalorder %s17_s15, %s17_s15 }
   0xf   :  { %p365_p5 = scmp.ne.s32.totalorder %s17_s15, %s364_s21  ;;  %p370_p7 = scmp.lt.s32.totalorder %s364_s21, %s364_s21 }
  0x11   :  { %p371_p8 = por %p370_p7, %p369_p6 }
  0x13   :  { %p372_p9 = pnand %p371_p8, %p365_p5 }
  0x15   :  { %375 = shalt.err (!%p372_p9)
}
  0x16   :  { %22 = dma.hbm_to_vmem [thread:$0]  %s481_s0, 512, %s17_s15, [#allocation3], %s424_s17, %s424_s17, %s425_s18  }
  0x17   :  { %s426_s24 = smov [#allocation7]  }
  0x18   :  { %s41_s25 = sshll.u32 %s426_s24, 4  ;;  %s42_s25 = int_to_ptr.vmem [resolvable:$true] %s41_s25 }
  0x19   :  { %s384_s26 = scalar_lea.vmem %s42_s25, 128  ;;  %p389_p11 = scmp.lt.s32.totalorder %s42_s25, %s42_s25 }
  0x1a   :  { %p385_p10 = scmp.ne.s32.totalorder %s42_s25, %s384_s26  ;;  %p390_p12 = scmp.lt.s32.totalorder %s384_s26, %s384_s26 }
  0x1c   :  { %p391_p13 = por %p390_p12, %p389_p11 }
  0x1e   :  { %p392_p0 = pnand %p391_p13, %p385_p10 }
  0x20   :  { %395 = shalt.err (!%p392_p0)
}
  0x21   :  { %44 = dma.hbm_to_vmem [thread:$0]  %s483_s2, 128, %s42_s25, [#allocation6]  }
  0x22   :  { %416 = dma.done.wait [#allocation3], 512  }
  0x23   :  { %417 = vsyncadd [#allocation3], 4294966784 }
  0x24   :  { %418 = dma.done.wait [#allocation6], 1152  }
  0x25   :  { %419 = vsyncadd [#allocation6], 4294966144  ;;  %v65_v0 = vld [vmem:[#allocation5 + $0x38] sm:$0xff]  ;;  %v64_v1 = vld [vmem:[#allocation5 + $0x30] sm:$0xff]  ;;  %vm71_vm0 = vcmask 523264   ;;  %s427_s0 = smov [#allocation8]  }
  0x26   :  { %284 = vmatprep.subr.mxu0 %v65_v0  ;;  %306 = vmatprep.subr.mxu1 %v65_v0  ;;  %v63_v2 = vld [vmem:[#allocation5 + $0x28] sm:$0xff]  ;;  %v62_v3 = vld [vmem:[#allocation5 + $0x20] sm:$0xff]  ;;  %v61_v4 = vld [vmem:[#allocation5 + $0x18] sm:$0xff]  ;;  %s252_s2 = sshll.u32 %s427_s0, 4  ;;  %s253_s2 = int_to_ptr.vmem [resolvable:$true] %s252_s2 }
  0x27   :  { %285 = vmatpush3.msra.mxu0 %v65_v0  ;;  %314 = vmatpush3.msra.mxu1 %v65_v0  ;;  %v60_v5 = vld [vmem:[#allocation5 + $0x10] sm:$0xff]  ;;  %v59_v6 = vld [vmem:[#allocation5 + $0x8] sm:$0xff]  ;;  %v58_v7 = vld [vmem:[#allocation5] sm:$0xff]  ;;  %s396_s28 = scalar_lea.vmem %s253_s2, 512  ;;  %p401_p2 = scmp.lt.s32.totalorder %s253_s2, %s253_s2 }
  0x28   :  { %286 = vmatprep.subr.mxu0 %v64_v1  ;;  %307 = vmatprep.subr.mxu1 %v64_v1  ;;  %v54_v8 = vld [vmem:[#allocation2] sm:$0xff]  ;;  %v56_v9 = vld [vmem:[#allocation2 + $0x10] sm:$0xff]  ;;  %v55_v10 = vld [vmem:[#allocation2 + $0x8] sm:$0xff]  ;;  %p397_p1 = scmp.ne.s32.totalorder %s253_s2, %s396_s28  ;;  %p402_p3 = scmp.lt.s32.totalorder %s396_s28, %s396_s28 }
  0x29   :  { %287 = vmatpush3.msra.mxu0 %v64_v1  ;;  %315 = vmatpush3.msra.mxu1 %v64_v1  ;;  %v57_v11 = vld [vmem:[#allocation2 + $0x18] sm:$0xff]  ;;  %v265_v12 = vld [vmem:[#allocation7] ss:$0 sm:$0xff]  ;;  %v270_v60 = vld [vmem:[#allocation7 + $0x1] ss:$0 sm:$0xff] }
  0x2a   :  { %288 = vmatprep.subr.mxu0 %v63_v2  ;;  %308 = vmatprep.subr.mxu1 %v63_v2  ;;  %v271_v0 = vld [vmem:[#allocation7 + $0x2] ss:$0 sm:$0xff]  ;;  %p403_p4 = por %p402_p3, %p401_p2 }
  0x2b   :  { %289 = vmatpush3.msra.mxu0 %v63_v2  ;;  %316 = vmatpush3.msra.mxu1 %v63_v2 }
  0x2c   :  { %290 = vmatprep.subr.mxu0 %v62_v3  ;;  %309 = vmatprep.subr.mxu1 %v62_v3  ;;  %p404_p5 = pnand %p403_p4, %p397_p1 }
  0x2d   :  { %291 = vmatpush3.msra.mxu0 %v62_v3  ;;  %317 = vmatpush3.msra.mxu1 %v62_v3 }
  0x2e   :  { %292 = vmatprep.subr.mxu0 %v61_v4  ;;  %310 = vmatprep.subr.mxu1 %v61_v4 }
  0x2f   :  { %293 = vmatpush3.msra.mxu0 %v61_v4  ;;  %318 = vmatpush3.msra.mxu1 %v61_v4 }
  0x30   :  { %294 = vmatprep.subr.mxu0 %v60_v5  ;;  %311 = vmatprep.subr.mxu1 %v60_v5 }
  0x31   :  { %295 = vmatpush3.msra.mxu0 %v60_v5  ;;  %319 = vmatpush3.msra.mxu1 %v60_v5 }
  0x32   :  { %296 = vmatprep.subr.mxu0 %v59_v6  ;;  %312 = vmatprep.subr.mxu1 %v59_v6 }
  0x33   :  { %297 = vmatpush3.msra.mxu0 %v59_v6  ;;  %320 = vmatpush3.msra.mxu1 %v59_v6 }
  0x34   :  { %298 = vmatprep.subr.mxu0 %v58_v7  ;;  %313 = vmatprep.subr.mxu1 %v58_v7 }
  0x35   :  { %299 = vmatpush3.msra.mxu0 %v58_v7  ;;  %321 = vmatpush3.msra.mxu1 %v58_v7 }
  0x36   :  { %300 = vmatprep.mubr.msk.f32.mxu0 %vm71_vm0, %v54_v8  ;;  %303 = vmatprep.mubr.msk.f32.mxu1 %vm71_vm0, %v56_v9 }
  0x37   :  { %301 = vmatmul.mubr.msk.f32.vlgmr.msra.gmra.mxu0 %vm71_vm0, %v55_v10  ;;  %304 = vmatmul.mubr.msk.f32.vlgmr.msra.gmra.mxu1 %vm71_vm0, %v57_v11 }
  0xf7   :  { %v302_v13 = vpop.f32.mrf.mxu0  ;;  %v305_v14 = vpop.f32.mrf.mxu1 }
  0xf8   :  { %v156_v15 = vadd.f32 %v302_v13, %v265_v12  ;;  %v463_v16 = vadd.f32 %v305_v14, %v265_v12 }
  0xf9   :  { %v150_v17 = vpop.f32.mrf.mxu0  ;;  %v160_v18 = vpop.f32.mrf.mxu1 }
  0xfa   :  { %175 = vadd.xlane.f32.xlu1 %v463_v16  ;;  %171 = vadd.xlane.f32.xlu0 %v156_v15  ;;  %v151_v19 = vadd.f32 %v265_v12, %v150_v17  ;;  %v466_v20 = vadd.f32 %v265_v12, %v160_v18  ;;  %v178_v21 = vmul.f32 %v156_v15, %v156_v15 }
  0xfb   :  { %v180_v23 = vmul.f32 %v463_v16, %v463_v16 }
  0xfc   :  { %v177_v22 = vmul.f32 %v151_v19, %v151_v19  ;;  %v179_v24 = vmul.f32 %v466_v20, %v466_v20 }
  0xfe   :  { %173 = vadd.xlane.f32.xlu1 %v466_v20  ;;  %169 = vadd.xlane.f32.xlu0 %v151_v19 }
 0x102   :  { %183 = vadd.xlane.f32.xlu1 %v178_v21  ;;  %181 = vadd.xlane.f32.xlu0 %v177_v22 }
 0x106   :  { %187 = vadd.xlane.f32.xlu1 %v180_v23  ;;  %185 = vadd.xlane.f32.xlu0 %v179_v24 }
 0x183   :  { %v176_v25 = vpop.xlane.xlu1 %175  ;;  %v172_v26 = vpop.xlane.xlu0 %171 }
 0x184   :  { %v190_v29 = vmul.f32 0.03125, %v172_v26  ;;  %v192_v31 = vmul.f32 0.03125, %v176_v25 }
 0x186   :  { %v198_v35 = vmul.f32 %v190_v29, %v190_v29  ;;  %v200_v41 = vmul.f32 %v192_v31, %v192_v31  ;;  %v210_v57 = vsub.f32 %v156_v15, %v190_v29  ;;  %v212_v1 = vsub.f32 %v463_v16, %v192_v31 }
 0x187   :  { %v174_v27 = vpop.xlane.xlu1 %173  ;;  %v170_v28 = vpop.xlane.xlu0 %169 }
 0x188   :  { %v189_v30 = vmul.f32 0.03125, %v170_v28  ;;  %v191_v32 = vmul.f32 0.03125, %v174_v27 }
 0x18a   :  { %v197_v36 = vmul.f32 %v189_v30, %v189_v30  ;;  %v199_v42 = vmul.f32 %v191_v32, %v191_v32  ;;  %v209_v59 = vsub.f32 %v151_v19, %v189_v30  ;;  %v211_v4 = vsub.f32 %v466_v20, %v191_v32 }
 0x18b   :  { %v184_v33 = vpop.xlane.xlu1 %183  ;;  %v182_v34 = vpop.xlane.xlu0 %181 }
 0x18c   :  { %v194_v37 = vmul.f32 0.03125, %v184_v33  ;;  %v193_v38 = vmul.f32 0.03125, %v182_v34 }
 0x18e   :  { %v202_v39 = vsub.f32 %v194_v37, %v198_v35  ;;  %v201_v40 = vsub.f32 %v193_v38, %v197_v36 }
 0x18f   :  { %v188_v43 = vpop.xlane.xlu1 %187  ;;  %v186_v44 = vpop.xlane.xlu0 %185 }
 0x190   :  { %v206_v45 = vmax.f32 %v202_v39, 0.0  ;;  %v205_v46 = vmax.f32 %v201_v40, 0.0  ;;  %v196_v47 = vmul.f32 0.03125, %v188_v43  ;;  %v195_v48 = vmul.f32 0.03125, %v186_v44 }
 0x192   :  { %v214_v49 = vadd.f32 1e-05, %v206_v45  ;;  %v213_v50 = vadd.f32 1e-05, %v205_v46  ;;  %v204_v51 = vsub.f32 %v196_v47, %v200_v41  ;;  %v203_v52 = vsub.f32 %v195_v48, %v199_v42 }
 0x194   :  { %328 = vrsqrt.f32 %v214_v49  ;;  %v208_v53 = vmax.f32 %v204_v51, 0.0  ;;  %v207_v54 = vmax.f32 %v203_v52, 0.0 }
 0x195   :  { %330 = vrsqrt.f32 %v213_v50 }
 0x196   :  { %v216_v55 = vadd.f32 1e-05, %v208_v53  ;;  %v215_v56 = vadd.f32 1e-05, %v207_v54 }
 0x198   :  { %332 = vrsqrt.f32 %v216_v55 }
 0x199   :  { %334 = vrsqrt.f32 %v215_v56 }
 0x1a1   :  { %v329_v58 = vpop.eup %328 }
 0x1a2   :  { %v331_v61 = vpop.eup %330  ;;  %v222_v62 = vmul.f32 %v329_v58, %v210_v57 }
 0x1a3   :  { %v221_v63 = vmul.f32 %v331_v61, %v209_v59 }
 0x1a4   :  { %v231_v2 = vmul.f32 %v270_v60, %v222_v62 }
 0x1a5   :  { %v333_v3 = vpop.eup %332  ;;  %v230_v5 = vmul.f32 %v270_v60, %v221_v63 }
 0x1a6   :  { %v335_v6 = vpop.eup %334  ;;  %v224_v7 = vmul.f32 %v333_v3, %v212_v1  ;;  %v240_v8 = vadd.f32 %v271_v0, %v231_v2 }
 0x1a7   :  { %v223_v9 = vmul.f32 %v335_v6, %v211_v4  ;;  %v239_v10 = vadd.f32 %v271_v0, %v230_v5 }
 0x1a8   :  { %v233_v11 = vmul.f32 %v270_v60, %v224_v7  ;;  %244 = vst [vmem:[#allocation8 + $0x8] sm:$0xff] %v240_v8 }
 0x1a9   :  { %v232_v12 = vmul.f32 %v270_v60, %v223_v9  ;;  %243 = vst [vmem:[#allocation8] sm:$0xff] %v239_v10 }
 0x1aa   :  { %v242_v13 = vadd.f32 %v271_v0, %v233_v11 }
 0x1ab   :  { %v241_v14 = vadd.f32 %v271_v0, %v232_v12 }
 0x1ac   :  { %246 = vst [vmem:[#allocation8 + $0x18] sm:$0xff] %v242_v13 }
 0x1ad   :  { %245 = vst [vmem:[#allocation8 + $0x10] sm:$0xff] %v241_v14 }
 0x1ae   :  { %407 = shalt.err (!%p404_p5)
}
 0x1af   :  { %258 = dma.vmem_to_hbm [thread:$0]  %s253_s2, 512, %s484_s3, [#allocation4], %s424_s17, %s424_s17, %s425_s18  }
 0x1b0   :  { %420 = dma.done.wait [#allocation4], 512  }
 0x1b1   :  { %421 = vsyncadd [#allocation4], 4294966784 }
 0x1b2   :  { %262 = vsyncpa [#allocation3], 1 }
 0x1b3   :  { %263 = vsyncpa [#allocation6], 1 }
 0x1b4   :  { %264 = vsyncpa [#allocation4], 1 }

</bundles_post_ra>
